<compile_context>
chip_gen: v6e
topology: v6e:2x2x1
jax: 0.10.0
libtpu: 0.0.40
codegen_flags: <defaults>
</compile_context>

<pallas_src>
import jax
import jax.numpy as jnp
from jax.experimental import pallas as pl
from jax.experimental.pallas import tpu as pltpu


def _detect_vmem_bytes():
    """Physical VMEM per core; conservative 64 MiB (v7x) fallback."""
    default = 64 * 1024 * 1024
    try:
        info = pltpu.get_tpu_info()
        v = getattr(info, "vmem_capacity_bytes", None)
        if v:
            return int(v)
    except Exception:
        pass
    return default


def _pick_tiles(nc, hw, itemsize, budget):
    """Pick (row_tile, hw_tile).

    row_tile is a multiple of 128 or == nc; hw_tile is a multiple of 128 or
    == hw; row_tile * hw_tile * itemsize <= budget whenever possible.
    """
    row_bytes = hw * itemsize
    if nc * row_bytes <= budget:
        return int(nc), int(hw)

    rows_fit = budget // max(row_bytes, 1)
    r128 = (rows_fit // 128) * 128
    if r128 >= 128:
        return int(r128), int(hw)

    # Even 128 full rows don't fit -> split the H*W reduction axis.
    r = nc if nc < 128 else 128
    hk_fit = budget // max(r * itemsize, 1)
    hk = max(128, (hk_fit // 128) * 128)
    if hk >= hw:
        hk = hw
    return int(r), int(hk)


def _make_kernel(hw, hk):
    needs_mask = (hw % hk) != 0  # only possible when the reduction is split
    inv_hw = 1.0 / float(hw)

    def kernel(x_ref, omax_ref, oavg_ref, max_acc, sum_acc):
        k = pl.program_id(1)
        nk = pl.num_programs(1)

        @pl.when(k == 0)
        def _():
            max_acc[...] = jnp.full_like(max_acc, -jnp.inf)
            sum_acc[...] = jnp.zeros_like(sum_acc)

        x = x_ref[...].astype(jnp.float32)  # (R, HK)

        if needs_mask:
            # Tail block of the reduction axis reads past H*W: mask pad lanes
            # with the reduction identities (-inf for max, 0 for sum).
            lane = jax.lax.broadcasted_iota(jnp.int32, x.shape, 1)
            valid = hw - k * hk
            m = lane < valid
            x_max = jnp.where(m, x, -jnp.inf)
            x_sum = jnp.where(m, x, 0.0)
        else:
            x_max = x
            x_sum = x

        pmax = jnp.max(x_max, axis=-1)  # (R,)
        psum = jnp.sum(x_sum, axis=-1)  # (R,) f32 accumulation for the mean
        max_acc[...] = jnp.maximum(max_acc[...], pmax[None, :])
        sum_acc[...] = sum_acc[...] + psum[None, :]

        @pl.when(k == nk - 1)
        def _():
            omax_ref[...] = max_acc[...].astype(omax_ref.dtype)
            oavg_ref[...] = (sum_acc[...] * inv_hw).astype(oavg_ref.dtype)

    return kernel


def adaptive_concat_pool2d(x, *, block_budget_bytes=None):
    """x: [N, C, H, W] -> [N, 2*C, 1, 1] = cat([adaptive_max, adaptive_avg], ch)."""
    N, C, H, W = x.shape
    HW = H * W
    NC = N * C
    itemsize = jnp.dtype(x.dtype).itemsize

    phys_vmem = _detect_vmem_bytes()
    if block_budget_bytes is None:
        # Bigger blocks amortize the ~0.35us/step overhead; capped by VMEM gen.
        block_budget_bytes = (28 << 20) if phys_vmem >= (100 << 20) else (20 << 20)

    # Contiguous reshape in HBM (free): rows = (n, c) pairs, lanes = H*W.
    xf = x.reshape(NC, HW)

    R, HK = _pick_tiles(NC, HW, itemsize, block_budget_bytes)
    num_r = pl.cdiv(NC, R)
    num_k = pl.cdiv(HW, HK)

    # Give the "parallel" axis >= 2 steps when everything fit in one block so
    # both v7x TensorCores get work (negligible cost on 1-TC chips).
    if num_r == 1 and NC >= 256:
        R = 128 * pl.cdiv(pl.cdiv(NC, 2), 128)
        num_r = pl.cdiv(NC, R)

    in_block = R * HK * itemsize
    out_block = R * itemsize
    vmem_needed = 2 * in_block + 4 * out_block + 2 * R * 4 + (2 << 20)
    vmem_cap = min(int(phys_vmem * 0.8), 100 << 20)
    vmem_limit = int(min(max(vmem_needed, 32 << 20), vmem_cap))

    kernel = _make_kernel(HW, HK)

    out_max, out_avg = pl.pallas_call(
        kernel,
        out_shape=(
            jax.ShapeDtypeStruct((1, NC), x.dtype),
            jax.ShapeDtypeStruct((1, NC), x.dtype),
        ),
        grid_spec=pltpu.PrefetchScalarGridSpec(
            num_scalar_prefetch=0,
            grid=(num_r, num_k),
            in_specs=[pl.BlockSpec((R, HK), lambda i, k: (i, k))],
            out_specs=[
                pl.BlockSpec((1, R), lambda i, k: (0, i)),
                pl.BlockSpec((1, R), lambda i, k: (0, i)),
            ],
            scratch_shapes=[
                pltpu.VMEM((1, R), jnp.float32),  # running max
                pltpu.VMEM((1, R), jnp.float32),  # running sum
            ],
        ),
        compiler_params=pltpu.CompilerParams(
            dimension_semantics=("parallel", "arbitrary"),
            vmem_limit_bytes=vmem_limit,
        ),
        cost_estimate=pl.CostEstimate(
            flops=2 * NC * HW,
            transcendentals=0,
            bytes_accessed=NC * HW * itemsize + 2 * NC * itemsize,
        ),
    )(xf)

    mx = out_max.reshape(N, C)
    av = out_avg.reshape(N, C)
    # torch.cat([max_pool, avg_pool], dim=1)
    return jnp.concatenate([mx, av], axis=1).reshape(N, 2 * C, 1, 1)


def _reference(x):
    N, C, _, _ = x.shape
    rm = jnp.max(x, axis=(2, 3))
    ra = jnp.mean(x, axis=(2, 3))
    return jnp.concatenate([rm, ra], axis=1).reshape(N, 2 * C, 1, 1)


if __name__ == "__main__":
    # Primary small shape implied by the module.
    x1 = jax.random.normal(jax.random.PRNGKey(0), (2, 4, 16, 16), dtype=jnp.float32)
    y1 = adaptive_concat_pool2d(x1)
    jax.block_until_ready(y1)
    assert y1.shape == (2, 8, 1, 1), y1.shape
    assert jnp.allclose(y1, _reference(x1), atol=1e-5, rtol=1e-5), "mismatch (16x16)"

    # Non-lane-aligned spatial size (7x7) with all-negative values: verifies the
    # max reduction over a padded lane dim does not pick up zeros.
    x2 = -jnp.abs(jax.random.normal(jax.random.PRNGKey(1), (2, 4, 7, 7), jnp.float32)) - 1.0
    y2 = adaptive_concat_pool2d(x2)
    jax.block_until_ready(y2)
    assert jnp.allclose(y2, _reference(x2), atol=1e-5, rtol=1e-5), "mismatch (7x7)"

    # Larger case: exercises the >=2 parallel row blocks path (dual-TC sharding).
    x3 = jax.random.normal(jax.random.PRNGKey(2), (1, 256, 32, 32), dtype=jnp.float32)
    y3 = adaptive_concat_pool2d(x3)
    jax.block_until_ready(y3)
    assert jnp.allclose(y3, _reference(x3), atol=1e-4, rtol=1e-4), "mismatch (row split)"

    # Tiny budget forces the H*W reduction grid axis + tail-lane masking.
    x4 = jax.random.normal(jax.random.PRNGKey(3), (1, 128, 20, 20), dtype=jnp.float32)
    y4 = adaptive_concat_pool2d(x4, block_budget_bytes=128 * 256 * 4)
    jax.block_until_ready(y4)
    assert jnp.allclose(y4, _reference(x4), atol=1e-4, rtol=1e-4), "mismatch (hw split)"

    print("KERNEL_OK")
</pallas_src>

<mosaic_0001>
module attributes {stable_mosaic.version = 11 : i64} {
  func.func @kernel(%arg0: i32, %arg1: i32, %arg2: memref<8x256xf32, #tpu.memory_space<vmem>>, %arg3: memref<1x8xf32, #tpu.memory_space<vmem>>, %arg4: memref<1x8xf32, #tpu.memory_space<vmem>>, %arg5: memref<1x8xf32, #tpu.memory_space<vmem>>, %arg6: memref<1x8xf32, #tpu.memory_space<vmem>>) attributes {dimension_semantics = [#tpu.dimension_semantics<parallel>, #tpu.dimension_semantics<arbitrary>], iteration_bounds = array<i64: 1, 1>, scalar_prefetch = 0 : i64, scratch_operands = 2 : i64, tpu.core_type = #tpu.core_type<tc>, window_params = [{transform_indices = @transform_0, window_bounds = array<i64: 8, 256>}, {transform_indices = @transform_1, window_bounds = array<i64: 1, 8>}, {transform_indices = @transform_2, window_bounds = array<i64: 1, 8>}]} {
    %c0_i32 = arith.constant 0 : i32
    %0 = arith.cmpi eq, %arg1, %c0_i32 : i32
    %1 = arith.extui %0 : i1 to i32
    %c0_i32_0 = arith.constant 0 : i32
    %2 = arith.cmpi ne, %1, %c0_i32_0 : i32
    scf.if %2 {
      %cst_13 = arith.constant 0xFF800000 : f32
      %17 = vector.broadcast %cst_13 : f32 to vector<1x8xf32>
      %c0_14 = arith.constant 0 : index
      %c0_15 = arith.constant 0 : index
      %18 = vector.load %arg5[%c0_14, %c0_15] : memref<1x8xf32, #tpu.memory_space<vmem>>, vector<1x8xf32>
      tpu.vector_store %arg5[%c0_14, %c0_15], %17 {strides = array<i32>} : memref<1x8xf32, #tpu.memory_space<vmem>>, vector<1x8xf32>,
      %cst_16 = arith.constant 0.000000e+00 : f32
      %19 = vector.broadcast %cst_16 : f32 to vector<1x8xf32>
      %c0_17 = arith.constant 0 : index
      %c0_18 = arith.constant 0 : index
      %20 = vector.load %arg6[%c0_17, %c0_18] : memref<1x8xf32, #tpu.memory_space<vmem>>, vector<1x8xf32>
      tpu.vector_store %arg6[%c0_17, %c0_18], %19 {strides = array<i32>} : memref<1x8xf32, #tpu.memory_space<vmem>>, vector<1x8xf32>,
    } else {
    }
    %c0 = arith.constant 0 : index
    %c0_1 = arith.constant 0 : index
    %3 = vector.load %arg2[%c0, %c0_1] : memref<8x256xf32, #tpu.memory_space<vmem>>, vector<8x256xf32>
    %cst = arith.constant dense<0xFF800000> : vector<8xf32>
    %4 = vector.multi_reduction <maximumf>, %3, %cst [1] : vector<8x256xf32> to vector<8xf32>
    %cst_2 = arith.constant dense<0.000000e+00> : vector<8xf32>
    %5 = vector.multi_reduction <add>, %3, %cst_2 [1] : vector<8x256xf32> to vector<8xf32>
    %c0_3 = arith.constant 0 : index
    %c0_4 = arith.constant 0 : index
    %6 = vector.load %arg5[%c0_3, %c0_4] : memref<1x8xf32, #tpu.memory_space<vmem>>, vector<1x8xf32>
    %7 = vector.shape_cast %4 : vector<8xf32> to vector<1x8xf32>
    %8 = arith.maximumf %6, %7 : vector<1x8xf32>
    %c0_5 = arith.constant 0 : index
    %c0_6 = arith.constant 0 : index
    %9 = vector.load %arg5[%c0_5, %c0_6] : memref<1x8xf32, #tpu.memory_space<vmem>>, vector<1x8xf32>
    tpu.vector_store %arg5[%c0_5, %c0_6], %8 {strides = array<i32>} : memref<1x8xf32, #tpu.memory_space<vmem>>, vector<1x8xf32>,
    %c0_7 = arith.constant 0 : index
    %c0_8 = arith.constant 0 : index
    %10 = vector.load %arg6[%c0_7, %c0_8] : memref<1x8xf32, #tpu.memory_space<vmem>>, vector<1x8xf32>
    %11 = vector.shape_cast %5 : vector<8xf32> to vector<1x8xf32>
    %12 = arith.addf %10, %11 : vector<1x8xf32>
    %c0_9 = arith.constant 0 : index
    %c0_10 = arith.constant 0 : index
    %13 = vector.load %arg6[%c0_9, %c0_10] : memref<1x8xf32, #tpu.memory_space<vmem>>, vector<1x8xf32>
    tpu.vector_store %arg6[%c0_9, %c0_10], %12 {strides = array<i32>} : memref<1x8xf32, #tpu.memory_space<vmem>>, vector<1x8xf32>,
    %c0_i32_11 = arith.constant 0 : i32
    %14 = arith.cmpi eq, %arg1, %c0_i32_11 : i32
    %15 = arith.extui %14 : i1 to i32
    %c0_i32_12 = arith.constant 0 : i32
    %16 = arith.cmpi ne, %15, %c0_i32_12 : i32
    scf.if %16 {
      %c0_13 = arith.constant 0 : index
      %c0_14 = arith.constant 0 : index
      %17 = vector.load %arg5[%c0_13, %c0_14] : memref<1x8xf32, #tpu.memory_space<vmem>>, vector<1x8xf32>
      %c0_15 = arith.constant 0 : index
      %c0_16 = arith.constant 0 : index
      %18 = vector.load %arg3[%c0_15, %c0_16] : memref<1x8xf32, #tpu.memory_space<vmem>>, vector<1x8xf32>
      tpu.vector_store %arg3[%c0_15, %c0_16], %17 {strides = array<i32>} : memref<1x8xf32, #tpu.memory_space<vmem>>, vector<1x8xf32>,
      %c0_17 = arith.constant 0 : index
      %c0_18 = arith.constant 0 : index
      %19 = vector.load %arg6[%c0_17, %c0_18] : memref<1x8xf32, #tpu.memory_space<vmem>>, vector<1x8xf32>
      %cst_19 = arith.constant 3.906250e-03 : f32
      %20 = vector.broadcast %cst_19 : f32 to vector<1x8xf32>
      %21 = arith.mulf %19, %20 : vector<1x8xf32>
      %c0_20 = arith.constant 0 : index
      %c0_21 = arith.constant 0 : index
      %22 = vector.load %arg4[%c0_20, %c0_21] : memref<1x8xf32, #tpu.memory_space<vmem>>, vector<1x8xf32>
      tpu.vector_store %arg4[%c0_20, %c0_21], %21 {strides = array<i32>} : memref<1x8xf32, #tpu.memory_space<vmem>>, vector<1x8xf32>,
    } else {
    }
    return
  }
  func.func @transform_0(%arg0: i32, %arg1: i32) -> (i32, i32) {
    %c0_i32 = arith.constant 0 : i32
    return %arg0, %arg1 : i32, i32
  }
  func.func @transform_1(%arg0: i32, %arg1: i32) -> (i32, i32) {
    %c0_i32 = arith.constant 0 : i32
    %c0_i32_0 = arith.constant 0 : i32
    return %c0_i32, %arg0 : i32, i32
  }
  func.func @transform_2(%arg0: i32, %arg1: i32) -> (i32, i32) {
    %c0_i32 = arith.constant 0 : i32
    %c0_i32_0 = arith.constant 0 : i32
    return %c0_i32, %arg0 : i32, i32
  }
}

</mosaic_0001>

<bundles_post_ra>
// kernel: tpu_custom_call.1
= control target key start
LH: loop header
LB: loop body
LE: loop exit
PB: predicated region body
PF: predicated region fallthrough
CT: control target
= control target key end

     0   :  { %8 = vsyncpa [#allocation5], 0  ;;  %s409_s0 = inlined_call_operand.hbm [shape: f32[8,256], index: 0, kind: input, shape index: {}]   ;;  %s410_s1 = inlined_call_operand.hbm [shape: f32[1,8], index: 1, kind: output, shape index: {0}]   ;;  %s411_s2 = inlined_call_operand.hbm [shape: f32[1,8], index: 2, kind: output, shape index: {1}]  }
   0x1   :  { %9 = vsyncpa [#allocation6], 0 }
   0x2   :  { %10 = vsyncpa [#allocation9], 0  ;;  %s368_s9 = smov [#allocation4]  }
   0x3   :  { %s17_s10 = sshll.u32 %s368_s9, 4  ;;  %s18_s10 = int_to_ptr.vmem [resolvable:$true] %s17_s10 }
   0x4   :  { %s310_s11 = scalar_lea.vmem %s18_s10, 256  ;;  %p315_p1 = scmp.lt.s32.totalorder %s18_s10, %s18_s10 }
   0x5   :  { %p311_p0 = scmp.ne.s32.totalorder %s18_s10, %s310_s11  ;;  %p316_p2 = scmp.lt.s32.totalorder %s310_s11, %s310_s11 }
   0x7   :  { %p317_p3 = por %p316_p2, %p315_p1 }
   0x9   :  { %p318_p4 = pnand %p317_p3, %p311_p0 }
   0xb   :  { %321 = shalt.err (!%p318_p4)
}
   0xc   :  { %20 = dma.hbm_to_vmem [thread:$0]  %s409_s0, 256, %s18_s10, [#allocation5]  }
   0xd   :  { %362 = dma.done.wait [#allocation5], 256  }
   0xe   :  { %363 = vsyncadd [#allocation5], 4294967040  ;;  %v31_v0 = vld [vmem:[#allocation4] sm:$0xff]  ;;  %v32_v1 = vld [vmem:[#allocation4 + $0x8] sm:$0xff]  ;;  %v369_v4 = vmov 0   ;;  %v41_v5 = vlaneseq  ;;  %vm28_vm0 = vcmask 57344  }
   0xf   :  { %v36_v2 = vadd.f32 %v32_v1, %v31_v0  ;;  %v33_v3 = vmax.f32 %v31_v0, %v32_v1  ;;  %300 = vset.pattern.permute.xlu1 %v369_v4  ;;  %301 = vset.pattern.permute.xlu0 %v369_v4  ;;  %v370_v8 = vmov 0.0   ;;  %v371_v10 = vmov 1966171168   ;;  %s373_s0 = smov [#allocation8]   ;;  %s374_s15 = smov [#allocation7]  }
  0x10   :  { %v42_v6 = vshrl.u32 %v41_v5, 7  ;;  %v126_v7 = vand.u32 127, %v41_v5  ;;  %30 = vst.msk [vmem:[#allocation3] sm:$0x1] %vm28_vm0, %v370_v8  ;;  %v78_v11 = vunpack.c.l.s4 %v371_v10  ;;  %v372_v0 = vmov -inf   ;;  %s280_s14 = sshll.u32 %s373_s0, 4  ;;  %s281_s14 = int_to_ptr.vmem [resolvable:$true] %s280_s14 }
  0x11   :  { %37 = vadd.xlane.f32.xlu0 %v36_v2  ;;  %29 = vst.msk [vmem:[#allocation2] sm:$0x1] %vm28_vm0, %v372_v0  ;;  %s270_s16 = sshll.u32 %s374_s15, 4  ;;  %s322_s17 = scalar_lea.vmem %s281_s14, 16  ;;  %s271_s16 = int_to_ptr.vmem [resolvable:$true] %s270_s16 }
  0x12   :  { %v394_v9 = vsub.s32 %v126_v7, %v42_v6  ;;  %v79_v12 = vunpack.c.0.s8 %v78_v11  ;;  %v43_v13 = vsub.s32 0, %v42_v6  ;;  %v47_v14 = vsub.s32 1, %v42_v6  ;;  %p323_p5 = scmp.ne.s32.totalorder %s281_s14, %s322_s17  ;;  %s326_s18 = scalar_lea.vmem %s281_s14, 32 }
  0x13   :  { %v51_v15 = vsub.s32 2, %v42_v6  ;;  %v55_v16 = vsub.s32 3, %v42_v6  ;;  %v59_v17 = vsub.s32 4, %v42_v6  ;;  %v63_v18 = vsub.s32 5, %v42_v6  ;;  %p327_p6 = scmp.lt.s32.totalorder %s281_s14, %s281_s14  ;;  %p328_p7 = scmp.lt.s32.totalorder %s326_s18, %s322_s17 }
  0x14   :  { %v67_v19 = vsub.s32 6, %v42_v6  ;;  %v71_v20 = vsub.s32 7, %v42_v6  ;;  %v82_v22 = vsub.s32 %v79_v12, %v42_v6 }
  0x15   :  { %34 = vmax.xlane.f32.xlu0 %v33_v3  ;;  %p329_p8 = por %p328_p7, %p327_p6 }
  0x17   :  { %v149_v6 = vld [vmem:[#allocation3] sm:$0x1]  ;;  %p330_p9 = pnand %p329_p8, %p323_p5 }
  0x9a   :  { %v38_v21 = vpop.xlane.xlu0 %37 }
  0x9b   :  { %v154_v23 = vrot.slane %v38_v21, %v43_v13  ;;  %v158_v24 = vrot.slane %v38_v21, %v47_v14  ;;  %v162_v25 = vrot.slane %v38_v21, %v51_v15  ;;  %v166_v26 = vrot.slane %v38_v21, %v55_v16 }
  0x9c   :  { %v170_v27 = vrot.slane %v38_v21, %v59_v17  ;;  %v174_v28 = vrot.slane %v38_v21, %v63_v18  ;;  %v178_v29 = vrot.slane %v38_v21, %v67_v19  ;;  %v182_v30 = vrot.slane %v38_v21, %v71_v20 }
  0x9d   :  { %v183_v31 = vcombine.low %v154_v23, %v158_v24  ;;  %v184_v32 = vcombine.low %v162_v25, %v166_v26 }
  0x9e   :  { %v35_v33 = vpop.xlane.xlu0 %34  ;;  %v185_v34 = vcombine.low %v170_v27, %v174_v28  ;;  %v186_v35 = vcombine.low %v178_v29, %v182_v30 }
  0x9f   :  { %v193_v36 = vrot.slane %v183_v31, %v82_v22  ;;  %v200_v37 = vrot.slane %v184_v32, %v82_v22  ;;  %v44_v38 = vrot.slane %v35_v33, %v43_v13  ;;  %v48_v39 = vrot.slane %v35_v33, %v47_v14  ;;  %v39_v13 = vld [vmem:[#allocation2] sm:$0x1] }
  0xa0   :  { %v207_v40 = vrot.slane %v185_v34, %v82_v22  ;;  %v214_v41 = vrot.slane %v186_v35, %v82_v22  ;;  %v52_v42 = vrot.slane %v35_v33, %v51_v15  ;;  %v56_v43 = vrot.slane %v35_v33, %v55_v16 }
  0xa1   :  { %v215_v44 = vcombine.low %v193_v36, %v200_v37  ;;  %v60_v45 = vrot.slane %v35_v33, %v59_v17  ;;  %v64_v46 = vrot.slane %v35_v33, %v63_v18  ;;  %v68_v47 = vrot.slane %v35_v33, %v67_v19 }
  0xa2   :  { %v216_v48 = vcombine.low %v207_v40, %v214_v41  ;;  %v72_v49 = vrot.slane %v35_v33, %v71_v20  ;;  %v73_v50 = vcombine.low %v44_v38, %v48_v39  ;;  %v74_v51 = vcombine.low %v52_v42, %v56_v43 }
  0xa3   :  { %v223_v52 = vrot.slane %v215_v44, %v82_v22  ;;  %v75_v53 = vcombine.low %v60_v45, %v64_v46 }
  0xa4   :  { %v230_v54 = vrot.slane %v216_v48, %v82_v22  ;;  %v76_v55 = vcombine.low %v68_v47, %v72_v49  ;;  %v83_v56 = vrot.slane %v73_v50, %v82_v22  ;;  %v90_v57 = vrot.slane %v74_v51, %v82_v22 }
  0xa5   :  { %v97_v58 = vrot.slane %v75_v53, %v82_v22 }
  0xa6   :  { %v231_v59 = vcombine.low %v223_v52, %v230_v54  ;;  %v104_v60 = vrot.slane %v76_v55, %v82_v22  ;;  %v105_v61 = vcombine.low %v83_v56, %v90_v57 }
  0xa8   :  { %233 = vperm.xlu1 %300, %v231_v59   ;;  %v106_v62 = vcombine.low %v97_v58, %v104_v60  ;;  %v113_v63 = vrot.slane %v105_v61, %v82_v22 }
  0xaa   :  { %v120_v1 = vrot.slane %v106_v62, %v82_v22 }
  0xac   :  { %v121_v2 = vcombine.low %v113_v63, %v120_v1 }
  0xae   :  { %123 = vperm.xlu1 %300, %v121_v2  }
 0x123   :  { %v234_v3 = vpop.permute.xlu1 %233 }
 0x124   :  { %v238_v4 = vrot.slane %v234_v3, %v394_v9 }
 0x126   :  { %v245_v5 = vrot.slane %v238_v4, %v82_v22 }
 0x128   :  { %v252_v7 = vrot.slane %v245_v5, %v82_v22 }
 0x129   :  { %v124_v8 = vpop.permute.xlu1 %123 }
 0x12a   :  { %v254_v10 = vadd.f32 %v252_v7, %v149_v6  ;;  %v130_v11 = vrot.slane %v124_v8, %v394_v9 }
 0x12c   :  { %255 = vst.msk [vmem:[#allocation3] sm:$0x1] %vm28_vm0, %v254_v10  ;;  %v137_v12 = vrot.slane %v130_v11, %v82_v22 }
 0x12e   :  { %v144_v14 = vrot.slane %v137_v12, %v82_v22 }
 0x130   :  { %v146_v15 = vmax.f32 %v39_v13, %v144_v14 }
 0x132   :  { %148 = vst.msk [vmem:[#allocation2] sm:$0x1] %vm28_vm0, %v146_v15 }
 0x133   :  { %v261_v16 = vld [vmem:[#allocation3] sm:$0x1] }
 0x134   :  { %v262_v17 = vmul.f32 0.00390625, %v261_v16 }
 0x136   :  { %263 = vst.msk [vmem:[#allocation8] sm:$0x1] %vm28_vm0, %v262_v17 }
 0x137   :  { %333 = shalt.err (!%p330_p9)
}
 0x138   :  { %283 = dma.vmem_to_hbm [thread:$0]  %s281_s14, 16, %s411_s2, [#allocation9]  }
 0x139   :  { %v259_v9 = vld [vmem:[#allocation2] sm:$0x1]  ;;  %s342_s21 = scalar_lea.vmem %s271_s16, 16  ;;  %s346_s22 = scalar_lea.vmem %s271_s16, 32 }
 0x13a   :  { %260 = vst.msk [vmem:[#allocation7] sm:$0x1] %vm28_vm0, %v259_v9  ;;  %p343_p10 = scmp.ne.s32.totalorder %s271_s16, %s342_s21  ;;  %p347_p11 = scmp.lt.s32.totalorder %s271_s16, %s271_s16 }
 0x13b   :  { %p348_p12 = scmp.lt.s32.totalorder %s346_s22, %s342_s21 }
 0x13d   :  { %p349_p13 = por %p348_p12, %p347_p11 }
 0x13f   :  { %p350_p0 = pnand %p349_p13, %p343_p10 }
 0x141   :  { %353 = shalt.err (!%p350_p0)
}
 0x142   :  { %273 = dma.vmem_to_hbm [thread:$0]  %s271_s16, 16, %s410_s1, [#allocation6]  }
 0x143   :  { %364 = dma.done.wait [#allocation6], 16  }
 0x144   :  { %365 = vsyncadd [#allocation6], 4294967280 }
 0x145   :  { %366 = dma.done.wait [#allocation9], 16  }
 0x146   :  { %367 = vsyncadd [#allocation9], 4294967280 }
 0x147   :  { %290 = vsyncpa [#allocation5], 1 }
 0x148   :  { %291 = vsyncpa [#allocation6], 1 }
 0x149   :  { %292 = vsyncpa [#allocation9], 1 }

</bundles_post_ra>
